<compile_context>
chip_gen: v7x
topology: tpu7x:2x2x1
jax: 0.10.0
libtpu: 0.0.40
codegen_flags: <defaults>
</compile_context>

<pallas_src>
import math
import functools

import jax
import jax.numpy as jnp
from jax.experimental import pallas as pl
from jax.experimental.pallas import tpu as pltpu


# ----------------------------------------------------------------------------
# Pallas kernel:  y = GELU(x @ W01 + b01) @ W_fc2 + b_fc2
# (W01/b01 already contain the folded audio/visual Linear.)
# One grid step = (one branch, one row tile).  bf16 MXU, f32 accumulate.
# ----------------------------------------------------------------------------
_K1 = math.sqrt(2.0 / math.pi)       # GELU tanh-approx constants (pre-folded)
_K2 = _K1 * 0.044715


def _dual_mlp_kernel(x_ref, w1_ref, b1_ref, w2_ref, b2_ref, o_ref, *, ew_dtype):
    x = x_ref[...]                                            # (tm, D) bf16

    # fc1 (with the folded branch Linear): bf16 operands, f32 MXU accumulate.
    h = jnp.dot(x, w1_ref[...], preferred_element_type=jnp.float32)
    h = h.astype(ew_dtype) + b1_ref[...]          # bias pre-cast to ew_dtype

    # Constant-folded tanh GELU: 0.5*h*(1 + tanh(h*(k1 + k2*h*h)))
    # tanh runs on the EUP; remaining VALU ops stay in ew_dtype (bf16 on
    # v6e/v7x halves VALU issue + vreg pressure of the (tm, H) intermediate).
    hh = h * h
    t = jnp.tanh(h * (_K1 + _K2 * hh))
    g = (0.5 * h) * (1.0 + t)

    # fc2: bf16 operand, f32 accumulate; bias add on the small (tm, D) output.
    y = jnp.dot(g.astype(jnp.bfloat16), w2_ref[...],
                preferred_element_type=jnp.float32)
    y = y + b2_ref[...]

    o_ref[...] = y.astype(o_ref.dtype)


def _round_up(x, m):
    return (x + m - 1) // m * m


def _tpu_profile():
    """(vmem_limit_bytes, elementwise dtype, max_tile_m, single-buffer weights?)"""
    vmem_cap = None
    try:
        vmem_cap = int(pltpu.get_tpu_info().vmem_capacity_bytes)
    except Exception:
        vmem_cap = None
    kind = ""
    try:
        kind = jax.devices()[0].device_kind.lower()
    except Exception:
        pass
    if vmem_cap is None:
        vmem_cap = 64 * 1024 * 1024 if "v7" in kind else 128 * 1024 * 1024

    # Leave headroom for Mosaic internal scratch + double buffers.
    vmem_limit = max(min(vmem_cap - 16 * 1024 * 1024, 100 * 1024 * 1024),
                     32 * 1024 * 1024)
    # bf16 VALU/EUP only on v6e/v7x; keep f32 elementwise elsewhere (v5e, ...).
    ew_dtype = jnp.bfloat16 if ("v6" in kind or "v7" in kind) else jnp.float32
    # Bigger row tiles where VMEM is plentiful (v5e/v6e: 128 MiB physical).
    max_tile_m = 512 if vmem_cap >= 96 * 1024 * 1024 else 256
    # On v7x (64 MiB) single-buffer the constant weight blocks.
    single_buffer_weights = vmem_cap < 96 * 1024 * 1024
    return vmem_limit, ew_dtype, max_tile_m, single_buffer_weights


def fused_dual_mlp(x_stacked, w1, b1, w2, b2):
    """x_stacked: (2, M, D) f32 tokens for [audio, visual] -> (2, M, D) bf16."""
    BR, M, D = x_stacked.shape
    H = w1.shape[2]

    vmem_limit, ew_dtype, max_tile_m, single_w = _tpu_profile()

    # Large, lane-dense row tile; multiple of 16 (bf16 sublane packing).
    if M <= max_tile_m:
        tile_m = _round_up(M, 16)
    else:
        tile_m = max_tile_m
    M_pad = _round_up(M, tile_m)
    if M_pad != M:
        x_stacked = jnp.pad(x_stacked, ((0, 0), (0, M_pad - M), (0, 0)))

    # bf16 matmul operands; biases in the elementwise / f32 accumulate dtypes.
    x_bf = x_stacked.astype(jnp.bfloat16)
    w1b = w1.astype(jnp.bfloat16)
    w2b = w2.astype(jnp.bfloat16)
    b1c = b1.astype(ew_dtype)
    b2f = b2.astype(jnp.float32)

    grid = (BR, M_pad // tile_m)

    # Weight/bias blocks are constant across the row-tile axis; single-buffer
    # them where VMEM is tight (v7x), default double-buffering elsewhere so
    # branch-1 weights prefetch behind branch-0 compute.
    def w_spec(shape):
        if single_w:
            return pl.BlockSpec(shape, lambda b, i: (b, 0, 0),
                                pipeline_mode=pl.Buffered(1))
        return pl.BlockSpec(shape, lambda b, i: (b, 0, 0))

    flops = 2 * BR * M_pad * (2 * D * H)
    transcendentals = BR * M_pad * H
    bytes_accessed = (x_bf.nbytes + w1b.nbytes + w2b.nbytes
                      + b1c.nbytes + b2f.nbytes + BR * M_pad * D * 2)

    # TODO(synk): for production embed_dim (D >= ~1024) on v7x, add an inner
    # H-chunk loop with a (tile_m, D) f32 accumulator so W_fc1/W_fc2 stream in
    # chunks and the full (tile_m, H) activation never materializes.

    out = pl.pallas_call(
        functools.partial(_dual_mlp_kernel, ew_dtype=ew_dtype),
        out_shape=jax.ShapeDtypeStruct((BR, M_pad, D), jnp.bfloat16),
        grid_spec=pl.GridSpec(
            grid=grid,
            in_specs=[
                pl.BlockSpec((None, tile_m, D), lambda b, i: (b, i, 0)),  # x
                w_spec((None, D, H)),                                     # W01
                w_spec((None, 1, H)),                                     # b01
                w_spec((None, H, D)),                                     # W_fc2
                w_spec((None, 1, D)),                                     # b_fc2
            ],
            out_specs=pl.BlockSpec((None, tile_m, D), lambda b, i: (b, i, 0)),
        ),
        compiler_params=pltpu.CompilerParams(
            dimension_semantics=("parallel", "arbitrary"),
            vmem_limit_bytes=int(vmem_limit)),
        cost_estimate=pl.CostEstimate(flops=flops,
                                      transcendentals=transcendentals,
                                      bytes_accessed=bytes_accessed),
    )(x_bf, w1b, b1c, w2b, b2f)

    return out[:, :M, :]


# ----------------------------------------------------------------------------
# Parameter construction (deterministic, nn.Linear-style uniform init) and
# offline folding of the per-branch Linear into Mlp.fc1.
# Per-branch weights are stacked along a leading "branch" axis: [audio, visual].
# ----------------------------------------------------------------------------
def _linear_params(key, fan_in, fan_out):
    kw, kb = jax.random.split(key)
    bound = 1.0 / math.sqrt(fan_in)
    # Stored as (fan_in, fan_out): kernel computes x @ W (== x @ weight.T).
    w = jax.random.uniform(kw, (fan_in, fan_out), jnp.float32, -bound, bound)
    b = jax.random.uniform(kb, (1, fan_out), jnp.float32, -bound, bound)
    return w, b


def make_params(key, embed_dim, seq):
    D, H = embed_dim, 4 * embed_dim
    keys = jax.random.split(key, 7)
    a_lin = _linear_params(keys[0], D, D)
    a_fc1 = _linear_params(keys[1], D, H)
    a_fc2 = _linear_params(keys[2], H, D)
    v_lin = _linear_params(keys[3], D, D)
    v_fc1 = _linear_params(keys[4], D, H)
    v_fc2 = _linear_params(keys[5], H, D)
    return {
        "lin_w": jnp.stack([a_lin[0], v_lin[0]]),   # (2, D, D)
        "lin_b": jnp.stack([a_lin[1], v_lin[1]]),   # (2, 1, D)
        "fc1_w": jnp.stack([a_fc1[0], v_fc1[0]]),   # (2, D, H)
        "fc1_b": jnp.stack([a_fc1[1], v_fc1[1]]),   # (2, 1, H)
        "fc2_w": jnp.stack([a_fc2[0], v_fc2[0]]),   # (2, H, D)
        "fc2_b": jnp.stack([a_fc2[1], v_fc2[1]]),   # (2, 1, D)
        # fusion tokens: torch.randn(seq, 1, embed_dim)
        "fusion_tokens": jax.random.normal(keys[6], (seq, 1, embed_dim),
                                           jnp.float32),
    }


def fuse_branch_params(params):
    """Fold audio/visual Linear into fc1 (exact: no nonlinearity between)."""
    w01 = jnp.einsum("bij,bjk->bik", params["lin_w"], params["fc1_w"])        # (2,D,H)
    b01 = (jnp.einsum("bij,bjk->bik", params["lin_b"], params["fc1_w"])
           + params["fc1_b"])                                                 # (2,1,H)
    return {
        "fc1_w": w01, "fc1_b": b01,
        "fc2_w": params["fc2_w"], "fc2_b": params["fc2_b"],
        "fusion_tokens": params["fusion_tokens"],
    }


# ----------------------------------------------------------------------------
# Full forward pass (mirrors BottleAttentionNet.forward, eval mode)
# ----------------------------------------------------------------------------
def bottle_attention_forward(fused_params, audio, visual, *, seq=8):
    B, La, D = audio.shape
    _, Lv, _ = visual.shape
    Ma, Mv = B * La, B * Lv
    M = max(Ma, Mv)

    # TODO(synk): for strongly asymmetric La/Lv, pass per-branch row counts via
    # scalar prefetch and skip fully-padded row tiles instead of padding both
    # branches to max(Ma, Mv).
    a2d = audio.reshape(Ma, D)
    v2d = visual.reshape(Mv, D)
    if Ma < M:
        a2d = jnp.pad(a2d, ((0, M - Ma), (0, 0)))
    if Mv < M:
        v2d = jnp.pad(v2d, ((0, M - Mv), (0, 0)))
    x_stacked = jnp.stack([a2d, v2d], axis=0)                 # (2, M, D)

    out = fused_dual_mlp(
        x_stacked,
        fused_params["fc1_w"], fused_params["fc1_b"],
        fused_params["fc2_w"], fused_params["fc2_b"])         # (2, M, D) bf16

    audio2 = out[0, :Ma].reshape(B, La, D).astype(jnp.float32)
    visual2 = out[1, :Mv].reshape(B, Lv, D).astype(jnp.float32)

    # TODO(synk): MultiModalFusionEncoder (audioEncoder / visualEncoder /
    # fusion_encoder) is not defined in the provided source; treated as identity.
    audio_enc = audio2
    visual_enc = visual2

    # fusion_tokens.expand(-1, B, -1) -> (seq, B, D)
    fusion_tokens = jnp.broadcast_to(fused_params["fusion_tokens"], (seq, B, D))

    # permute(1, 0, 2): (B, L, D) -> (L, B, D)
    audio_sf = jnp.transpose(audio_enc, (1, 0, 2))
    visual_sf = jnp.transpose(visual_enc, (1, 0, 2))

    # cat([fusion_tokens, audio, visual], dim=0)
    multimodal_input = jnp.concatenate([fusion_tokens, audio_sf, visual_sf],
                                       axis=0)

    # fusion_encoder: identity (see TODO above)
    multimodal_output = multimodal_input

    # result = output.permute(1, 0, 2): (T, B, D) -> (B, T, D)
    return jnp.transpose(multimodal_output, (1, 0, 2))


# ----------------------------------------------------------------------------
if __name__ == "__main__":
    key = jax.random.PRNGKey(0)
    k_param, k_audio, k_visual = jax.random.split(key, 3)

    # Small but lane-dense shapes: batch=2, seq lens=8, embed_dim=128, seq=8.
    B, La, Lv, D, SEQ = 2, 8, 8, 128, 8

    params = make_params(k_param, D, SEQ)
    fused_params = fuse_branch_params(params)   # fold Linear into fc1 (once)

    audio = jax.random.normal(k_audio, (B, La, D), jnp.float32)
    visual = jax.random.normal(k_visual, (B, Lv, D), jnp.float32)

    fwd = jax.jit(functools.partial(bottle_attention_forward, seq=SEQ))
    out = fwd(fused_params, audio, visual)
    jax.block_until_ready(out)

    assert out.shape == (B, SEQ + La + Lv, D), out.shape
    assert bool(jnp.all(jnp.isfinite(out)))
    print("KERNEL_OK")
</pallas_src>

<mosaic_0001>
module attributes {stable_mosaic.version = 11 : i64} {
  func.func @_dual_mlp_kernel(%arg0: i32, %arg1: i32, %arg2: memref<1x16x128xbf16, #tpu.memory_space<vmem>>, %arg3: memref<1x128x512xbf16, #tpu.memory_space<vmem>>, %arg4: memref<1x1x512xf32, #tpu.memory_space<vmem>>, %arg5: memref<1x512x128xbf16, #tpu.memory_space<vmem>>, %arg6: memref<1x1x128xf32, #tpu.memory_space<vmem>>, %arg7: memref<1x16x128xbf16, #tpu.memory_space<vmem>>) attributes {dimension_semantics = [#tpu.dimension_semantics<parallel>, #tpu.dimension_semantics<arbitrary>], iteration_bounds = array<i64: 2, 1>, scalar_prefetch = 0 : i64, scratch_operands = 0 : i64, tpu.core_type = #tpu.core_type<tc>, window_params = [{transform_indices = @transform_0, window_bounds = array<i64: 1, 16, 128>}, {transform_indices = @transform_1, window_bounds = array<i64: 1, 128, 512>}, {transform_indices = @transform_2, window_bounds = array<i64: 1, 1, 512>}, {transform_indices = @transform_3, window_bounds = array<i64: 1, 512, 128>}, {transform_indices = @transform_4, window_bounds = array<i64: 1, 1, 128>}, {transform_indices = @transform_5, window_bounds = array<i64: 1, 16, 128>}]} {
    %c0 = arith.constant 0 : index
    %c0_0 = arith.constant 0 : index
    %c0_1 = arith.constant 0 : index
    %0 = vector.load %arg2[%c0, %c0_0, %c0_1] : memref<1x16x128xbf16, #tpu.memory_space<vmem>>, vector<1x16x128xbf16>
    %1 = vector.shape_cast %0 : vector<1x16x128xbf16> to vector<16x128xbf16>
    %c0_2 = arith.constant 0 : index
    %c0_3 = arith.constant 0 : index
    %c0_4 = arith.constant 0 : index
    %2 = vector.load %arg3[%c0_2, %c0_3, %c0_4] : memref<1x128x512xbf16, #tpu.memory_space<vmem>>, vector<1x128x512xbf16>
    %3 = vector.shape_cast %2 : vector<1x128x512xbf16> to vector<128x512xbf16>
    %cst = arith.constant dense<0.000000e+00> : vector<16x512xf32>
    %4 = tpu.matmul %1, %3, %cst {dimension_numbers = #tpu.dot_dimension_numbers<[1], [0], [0], [1], [0, 0, 1, 1], [], []>} : vector<16x128xbf16>, vector<128x512xbf16>, vector<16x512xf32> -> vector<16x512xf32>
    %c0_5 = arith.constant 0 : index
    %c0_6 = arith.constant 0 : index
    %c0_7 = arith.constant 0 : index
    %5 = vector.load %arg4[%c0_5, %c0_6, %c0_7] : memref<1x1x512xf32, #tpu.memory_space<vmem>>, vector<1x1x512xf32>
    %6 = vector.shape_cast %5 : vector<1x1x512xf32> to vector<1x512xf32>
    %7 = vector.broadcast %6 : vector<1x512xf32> to vector<16x512xf32>
    %8 = arith.addf %4, %7 : vector<16x512xf32>
    %9 = arith.mulf %8, %8 : vector<16x512xf32>
    %cst_8 = arith.constant 0.0356774069 : f32
    %10 = vector.broadcast %cst_8 : f32 to vector<16x512xf32>
    %11 = arith.mulf %10, %9 : vector<16x512xf32>
    %cst_9 = arith.constant 0.797884583 : f32
    %12 = vector.broadcast %cst_9 : f32 to vector<16x512xf32>
    %13 = arith.addf %12, %11 : vector<16x512xf32>
    %14 = arith.mulf %8, %13 : vector<16x512xf32>
    %15 = math.tanh %14 : vector<16x512xf32>
    %cst_10 = arith.constant 5.000000e-01 : f32
    %16 = vector.broadcast %cst_10 : f32 to vector<16x512xf32>
    %17 = arith.mulf %16, %8 : vector<16x512xf32>
    %cst_11 = arith.constant 1.000000e+00 : f32
    %18 = vector.broadcast %cst_11 : f32 to vector<16x512xf32>
    %19 = arith.addf %18, %15 : vector<16x512xf32>
    %20 = arith.mulf %17, %19 : vector<16x512xf32>
    %21 = arith.truncf %20 : vector<16x512xf32> to vector<16x512xbf16>
    %c0_12 = arith.constant 0 : index
    %c0_13 = arith.constant 0 : index
    %c0_14 = arith.constant 0 : index
    %22 = vector.load %arg5[%c0_12, %c0_13, %c0_14] : memref<1x512x128xbf16, #tpu.memory_space<vmem>>, vector<1x512x128xbf16>
    %23 = vector.shape_cast %22 : vector<1x512x128xbf16> to vector<512x128xbf16>
    %cst_15 = arith.constant dense<0.000000e+00> : vector<16x128xf32>
    %24 = tpu.matmul %21, %23, %cst_15 {dimension_numbers = #tpu.dot_dimension_numbers<[1], [0], [0], [1], [0, 0, 1, 1], [], []>} : vector<16x512xbf16>, vector<512x128xbf16>, vector<16x128xf32> -> vector<16x128xf32>
    %c0_16 = arith.constant 0 : index
    %c0_17 = arith.constant 0 : index
    %c0_18 = arith.constant 0 : index
    %25 = vector.load %arg6[%c0_16, %c0_17, %c0_18] : memref<1x1x128xf32, #tpu.memory_space<vmem>>, vector<1x1x128xf32>
    %26 = vector.shape_cast %25 : vector<1x1x128xf32> to vector<1x128xf32>
    %27 = vector.broadcast %26 : vector<1x128xf32> to vector<16x128xf32>
    %28 = arith.addf %24, %27 : vector<16x128xf32>
    %29 = arith.truncf %28 : vector<16x128xf32> to vector<16x128xbf16>
    %c0_19 = arith.constant 0 : index
    %c0_20 = arith.constant 0 : index
    %c0_21 = arith.constant 0 : index
    %30 = vector.load %arg7[%c0_19, %c0_20, %c0_21] : memref<1x16x128xbf16, #tpu.memory_space<vmem>>, vector<1x16x128xbf16>
    %31 = vector.shape_cast %30 : vector<1x16x128xbf16> to vector<16x128xbf16>
    %32 = vector.shape_cast %29 : vector<16x128xbf16> to vector<1x16x128xbf16>
    tpu.vector_store %arg7[%c0_19, %c0_20, %c0_21], %32 {strides = array<i32>} : memref<1x16x128xbf16, #tpu.memory_space<vmem>>, vector<1x16x128xbf16>,
    return
  }
  func.func @transform_0(%arg0: i32, %arg1: i32) -> (i32, i32, i32) {
    %c0_i32 = arith.constant 0 : i32
    %c0_i32_0 = arith.constant 0 : i32
    return %arg0, %arg1, %c0_i32 : i32, i32, i32
  }
  func.func @transform_1(%arg0: i32, %arg1: i32) -> (i32, i32, i32) {
    %c0_i32 = arith.constant 0 : i32
    %c0_i32_0 = arith.constant 0 : i32
    %c0_i32_1 = arith.constant 0 : i32
    return %arg0, %c0_i32, %c0_i32_0 : i32, i32, i32
  }
  func.func @transform_2(%arg0: i32, %arg1: i32) -> (i32, i32, i32) {
    %c0_i32 = arith.constant 0 : i32
    %c0_i32_0 = arith.constant 0 : i32
    %c0_i32_1 = arith.constant 0 : i32
    return %arg0, %c0_i32, %c0_i32_0 : i32, i32, i32
  }
  func.func @transform_3(%arg0: i32, %arg1: i32) -> (i32, i32, i32) {
    %c0_i32 = arith.constant 0 : i32
    %c0_i32_0 = arith.constant 0 : i32
    %c0_i32_1 = arith.constant 0 : i32
    return %arg0, %c0_i32, %c0_i32_0 : i32, i32, i32
  }
  func.func @transform_4(%arg0: i32, %arg1: i32) -> (i32, i32, i32) {
    %c0_i32 = arith.constant 0 : i32
    %c0_i32_0 = arith.constant 0 : i32
    %c0_i32_1 = arith.constant 0 : i32
    return %arg0, %c0_i32, %c0_i32_0 : i32, i32, i32
  }
  func.func @transform_5(%arg0: i32, %arg1: i32) -> (i32, i32, i32) {
    %c0_i32 = arith.constant 0 : i32
    %c0_i32_0 = arith.constant 0 : i32
    return %arg0, %arg1, %c0_i32 : i32, i32, i32
  }
}

</mosaic_0001>

<bundles_post_ra>
// kernel: bottle_attention_forward.1
= control target key start
LH: loop header
LB: loop body
LE: loop exit
PB: predicated region body
PF: predicated region fallthrough
CT: control target
= control target key end

     0   :  { %s2368_s0 = inlined_call_operand.hbm [shape: bf16[2,16,128], index: 0, kind: input, shape index: {}]   ;;  %s2369_s1 = inlined_call_operand.hbm [shape: bf16[2,128,512], index: 1, kind: input, shape index: {}]   ;;  %s2370_s2 = inlined_call_operand.hbm [shape: f32[2,1,512], index: 2, kind: input, shape index: {}]   ;;  %s2371_s3 = inlined_call_operand.hbm [shape: bf16[2,512,128], index: 3, kind: input, shape index: {}]   ;;  %s2372_s4 = inlined_call_operand.hbm [shape: f32[2,1,128], index: 4, kind: input, shape index: {}]   ;;  %s2373_s5 = inlined_call_operand.hbm [shape: bf16[2,16,128], index: 5, kind: output, shape index: {}]  }
   0x1   :  { %2386 = sst [smem:[#allocation21_spill]] %s2369_s1 }
   0x2   :  { %2387 = sst [smem:[#allocation22_spill]] %s2371_s3 }
   0x3   :  { %10 = vsyncpa [#allocation3], 0 }
   0x4   :  { %12 = vsyncpa [#allocation3 + $0x1], 0 }
   0x5   :  { %13 = vsyncpa [#allocation6], 0 }
   0x6   :  { %15 = vsyncpa [#allocation6 + $0x1], 0 }
   0x7   :  { %16 = vsyncpa [#allocation9], 0 }
   0x8   :  { %18 = vsyncpa [#allocation9 + $0x1], 0 }
   0x9   :  { %19 = vsyncpa [#allocation4], 0 }
   0xa   :  { %21 = vsyncpa [#allocation4 + $0x1], 0  ;;  %s1950_s18 = smov 0   ;;  %s1952_s19 = smov 0  }
   0xb   :  { %s1954_s20 = smov 0   ;;  %s1956_s21 = smov 0  }
   0xc   :  { %s1958_s22 = smov 0   ;;  %s1960_s23 = smov 0  }
   0xd LB: > { %2388 = sst [smem:[#allocation16_spill]] %s1893_s20  ;;  %s1981_s24 = sadd.s32 4294967295, %s1905_s23   ;;  %s1905_s23 = sphi %s1960_s23, %s27_s23   ;;  %s1901_s22 = sphi %s1958_s22, %s2420_s22   ;;  %s1897_s21 = sphi %s1956_s21, %s2419_s21   ;;  %s1893_s20 = sphi %s1954_s20, %s2415_s20   ;;  %s1889_s19 = sphi %s1952_s19, %s2418_s19   ;;  %s1885_s18 = sphi %s1950_s18, %s2417_s18  }
   0xe   : > { %2389 = sst [smem:[#allocation17_spill]] %s1905_s23  ;;  %s1328_s25 = sadd.s32 4294967294, %s1905_s23  }
   0xf   : > { %s39_s26 = sadd.s32 1, %s1901_s22  ;;  %s48_s27 = sadd.s32 1, %s1893_s20 }
  0x10   : > { %p41_p0 = scmp.ge.s32.totalorder %s39_s26, 2  ;;  %p55_p1 = scmp.ne.s32.totalorder %s1893_s20, %s1889_s19 }
  0x11   : > { %p56_p2 = scmp.eq.s32.totalorder %s1905_s23, 0  ;;  %p61_p3 = scmp.ne.s32.totalorder %s1889_s19, %s1885_s18 }
  0x12   : > { %s2422_s26 = smov (%p41_p0, %s39_s26), 0  ;;  %p62_p5 = scmp.eq.s32.totalorder %s1981_s24, 0 }
  0x13   : > { %2390 = sst [smem:[#allocation18_spill]] %s2422_s26  ;;  %p1993_p4 = por %p56_p2, %p55_p1 }
  0x14   : > { %s43_s29 = ssub.s32 %s1901_s22, %s2422_s26  ;;  %p191_p6 = scmp.eq.s32.totalorder %s1981_s24, 1 }
  0x15   : > { %p46_p7 = scmp.eq.s32.totalorder %s43_s29, 0  ;;  %p2001_p8 = por %p62_p5, %p61_p3 }
  0x16   : > { %p2005_p9 = por %p191_p6, %p55_p1  ;;  %p197_p10 = scmp.eq.s32.totalorder %s1328_s25, 1 }
  0x17   : > { %s2392_s30 = scalar_select %p2001_p8, 1, 0 }
  0x18   : > { %s2393_s6 = scalar_select %p2005_p9, 1, 0 }
  0x19   : > { %s2010_s7 = scalar_select %p46_p7, %s1893_s20, %s48_s27  }
  0x1a   : > { %p2012_p11 = por %p197_p10, %p61_p3  ;;  %p1511_p13 = scmp.lt.s32.totalorder %s1905_s23, 2 }
  0x1b   : > { %2394 = sst [smem:[#allocation19_spill]] %s2010_s7  ;;  %s2019_s9 = sand.u32 1, %s1893_s20  }
  0x1c   : > { %s2395_s8 = scalar_select %p2012_p11, 1, 0 }
  0x1d   : > { %s2376_s10 = sand.u32 1, %s1905_s23   ;;  %s2374_s11 = sshll.u32 %s2019_s9, 8 }
  0x1e   : > { %2396 = sst [smem:[#allocation20_spill]] %s2395_s8  ;;  %p2025_p0 = pnand %p1511_p13, %p1993_p4 }
  0x1f   : > { %s2375_s13 = sshll.u32 %s1901_s22, 12  ;;  %s2398_s1 = sld [smem:[#allocation21_spill]] }
  0x20   : > { %s2397_s12 = scalar_select %p2025_p0, 1, 0 }
  0x21   : > { %s244_s17 = scalar_lea.vmem [#allocation5], %s2374_s11  ;;  %s2043_s27 = scalar_lea.sflag [#allocation6], %s2376_s10 }
  0x22   : > { %s251_s25 = sshll.u32 %s244_s17, 4  ;;  %p2049_p2 = pneg %p2025_p0  ;;  %s2039_s25 = int_to_ptr.vmem [resolvable:$true] %s251_s25 }
  0x25   : > { %s2035_s16 = scalar_lea.hbm %s2398_s1, %s2375_s13  ;;  %s1670_s17 = scalar_lea.hbm %s2398_s1, 8192 }
  0x26   : > { %s1665_s28 = scalar_lea.hbm %s2035_s16, 4096  ;;  %p1671_p5 = scmp.lt.u32.totalorder %s2035_s16, %s2398_s1 }
  0x27   : > { %p1666_p1 = scmp.ne.s32.totalorder %s2035_s16, %s1665_s28  ;;  %p1672_p6 = scmp.lt.u32.totalorder %s1670_s17, %s1665_s28 }
  0x28   : > { %p1674_p10 = scmp.lt.u32.totalorder %s1665_s28, %s2035_s16 }
  0x29   : > { %p1668_p3 = pnand %p2049_p2, %p1666_p1  ;;  %p1673_p7 = por %p1672_p6, %p1671_p5 }
  0x2b   : > { %p1669_p4 = pneg %p1668_p3  ;;  %p1675_p13 = por %p1674_p10, %p1673_p7 }
  0x2d   : > { %p1676_p12 = pnand %p1675_p13, %p1669_p4 }
  0x2f   : > { %1679 = shalt.err (!%p1676_p12)
}
  0x30   : > { %s1680_s10 = scalar_lea.vmem %s2039_s25, 4096  ;;  %s1907_s14 = smov [#allocation5]  }
  0x31   : > { %p1681_p1 = scmp.ne.s32.totalorder %s2039_s25, %s1680_s10  ;;  %s1685_s15 = sshll.u32 %s1907_s14, 4  ;;  %s1686_s15 = int_to_ptr.vmem [resolvable:$false] %s1685_s15 }
  0x32   : > { %s1687_s11 = scalar_lea.vmem %s1686_s15, 8192  ;;  %p1688_p9 = scmp.lt.s32.totalorder %s2039_s25, %s1686_s15 }
  0x33   : > { %p1683_p3 = pnand %p1681_p1, %p2049_p2  ;;  %p1689_p8 = scmp.lt.s32.totalorder %s1687_s11, %s1680_s10 }
  0x35   : > { %p1684_p11 = pneg %p1683_p3  ;;  %p1690_p5 = por %p1689_p8, %p1688_p9 }
  0x37   : > { %p1691_p6 = pnand %p1690_p5, %p1684_p11 }
  0x39   : > { %1694 = shalt.err (!%p1691_p6)
}
  0x3a   : > { %s1908_s13 = smov 256   ;;  %s1909_s28 = smov 16  }
  0x3b   : > { %1497 = dma.hbm_to_vmem [thread:$0]  (!%p2025_p0), %s2035_s16, 4096, %s2039_s25, %s2043_s27, %s1908_s13, %s1908_s13, %s1909_s28  }
  0x3c   : > { %p1344_p12 = scmp.ge.s32.totalorder %s1905_s23, 1  ;;  %p316_p4 = scmp.lt.s32.totalorder %s1905_s23, 3 }
  0x3d   : > { %s2401_s17 = sshll.u32 %s1901_s22, 12  ;;  %s2402_s3 = sld [smem:[#allocation22_spill]] }
  0x3e   : > { %p2075_p7 = pnand %p1344_p12, %p316_p4  ;;  %s2403_s1 = sshll.u32 %s2019_s9, 8 }
  0x3f   : > { %s284_s26 = scalar_lea.vmem [#allocation8], %s2403_s1  ;;  %s2404_s16 = sand.u32 1, %s1905_s23  }
  0x40   : > { %s2400_s10 = scalar_select %p2075_p7, 1, 0 }
  0x41   : > { %s291_s7 = sshll.u32 %s284_s26, 4  ;;  %s2092_s25 = scalar_lea.sflag [#allocation9], %s2404_s16  ;;  %s2088_s7 = int_to_ptr.vmem [resolvable:$true] %s291_s7 }
  0x43   : > { %s2084_s11 = scalar_lea.hbm %s2402_s3, %s2401_s17  ;;  %s1700_s14 = scalar_lea.hbm %s2402_s3, 8192 }
  0x44   : > { %s1695_s13 = scalar_lea.hbm %s2084_s11, 4096  ;;  %p1701_p10 = scmp.lt.u32.totalorder %s2084_s11, %s2402_s3 }
  0x45   : > { %p1696_p8 = scmp.ne.s32.totalorder %s2084_s11, %s1695_s13  ;;  %p1702_p13 = scmp.lt.u32.totalorder %s1700_s14, %s1695_s13 }
  0x46   : > { %p1704_p3 = scmp.lt.u32.totalorder %s1695_s13, %s2084_s11 }
  0x47   : > { %p1698_p9 = pnand %p1696_p8, %p2049_p2  ;;  %p1703_p1 = por %p1702_p13, %p1701_p10 }
  0x49   : > { %p1699_p11 = pneg %p1698_p9  ;;  %p1705_p5 = por %p1704_p3, %p1703_p1 }
  0x4b   : > { %p1706_p6 = pnand %p1705_p5, %p1699_p11 }
  0x4d   : > { %1709 = shalt.err (!%p1706_p6)
}
  0x4e   : > { %s1710_s1 = scalar_lea.vmem %s2088_s7, 4096  ;;  %s1910_s26 = smov [#allocation8]  }
  0x4f   : > { %p1711_p12 = scmp.ne.s32.totalorder %s2088_s7, %s1710_s1  ;;  %s1715_s16 = sshll.u32 %s1910_s26, 4  ;;  %s1716_s16 = int_to_ptr.vmem [resolvable:$false] %s1715_s16 }
  0x50   : > { %s1717_s20 = scalar_lea.vmem %s1716_s16, 8192  ;;  %p1718_p9 = scmp.lt.s32.totalorder %s2088_s7, %s1716_s16 }
  0x51   : > { %p1713_p4 = pnand %p1711_p12, %p2049_p2  ;;  %p1719_p7 = scmp.lt.s32.totalorder %s1717_s20, %s1710_s1 }
  0x53   : > { %p1714_p8 = pneg %p1713_p4  ;;  %p1720_p10 = por %p1719_p7, %p1718_p9 }
  0x55   : > { %p1721_p13 = pnand %p1720_p10, %p1714_p8 }
  0x57   : > { %1724 = shalt.err (!%p1721_p13)
}
  0x58   : > { %s1911_s13 = smov 64   ;;  %s1912_s28 = smov 4  }
  0x59   : > { %1503 = dma.hbm_to_vmem [thread:$0]  (!%p2025_p0), %s2084_s11, 4096, %s2088_s7, %s2092_s25, %s1911_s13, %s1911_s13, %s1912_s28  }
  0x5a   : > { %s1331_s17 = sshll.u32 %s2019_s9, 3  ;;  %s1423_s14 = sshll.u32 %s1901_s22, 7 }
  0x5b   : > { %s2124_s26 = scalar_lea.hbm %s2368_s0, %s1423_s14  ;;  %s221_s16 = scalar_lea.vmem [#allocation2], %s1331_s17 }
  0x5c   : > { %s230_s20 = sshll.u32 %s221_s16, 4  ;;  %s1337_s3 = sshll.u32 %s2019_s9, 2  ;;  %s2126_s20 = int_to_ptr.vmem [resolvable:$true] %s230_s20 }
  0x5d   : > { %s218_s23 = scalar_lea.sflag [#allocation3], %s2019_s9  ;;  %s1725_s8 = scalar_lea.hbm %s2124_s26, 128 }
  0x5e   : > { %p1726_p7 = scmp.ne.s32.totalorder %s2124_s26, %s1725_s8  ;;  %s1730_s14 = scalar_lea.hbm %s2368_s0, 256 }
  0x5f   : > { %p1731_p3 = scmp.lt.u32.totalorder %s2124_s26, %s2368_s0  ;;  %p1732_p5 = scmp.lt.u32.totalorder %s1730_s14, %s1725_s8 }
  0x60   : > { %p1728_p11 = pnand %p1726_p7, %p2049_p2  ;;  %p1734_p12 = scmp.lt.u32.totalorder %s1725_s8, %s2124_s26 }
  0x61   : > { %p1733_p6 = por %p1732_p5, %p1731_p3 }
  0x62   : > { %p1729_p1 = pneg %p1728_p11 }
  0x63   : > { %p1735_p4 = por %p1734_p12, %p1733_p6 }
  0x65   : > { %p1736_p8 = pnand %p1735_p4, %p1729_p1 }
  0x67   : > { %1739 = shalt.err (!%p1736_p8)
}
  0x68   : > { %s1740_s17 = scalar_lea.vmem %s2126_s20, 128  ;;  %s1913_s16 = smov [#allocation2]  }
  0x69   : > { %p1741_p9 = scmp.ne.s32.totalorder %s2126_s20, %s1740_s17  ;;  %s1745_s7 = sshll.u32 %s1913_s16, 4  ;;  %s1746_s7 = int_to_ptr.vmem [resolvable:$false] %s1745_s7 }
  0x6a   : > { %s1747_s11 = scalar_lea.vmem %s1746_s7, 256  ;;  %p1748_p7 = scmp.lt.s32.totalorder %s2126_s20, %s1746_s7 }
  0x6b   : > { %p1743_p10 = pnand %p1741_p9, %p2049_p2  ;;  %p1749_p11 = scmp.lt.s32.totalorder %s1747_s11, %s1740_s17 }
  0x6d   : > { %p1744_p13 = pneg %p1743_p10  ;;  %p1750_p3 = por %p1749_p11, %p1748_p7 }
  0x6f   : > { %p1751_p5 = pnand %p1750_p3, %p1744_p13 }
  0x71   : > { %1754 = shalt.err (!%p1751_p5)
}
  0x72   : > { %1494 = dma.hbm_to_vmem [thread:$0]  (!%p2025_p0), %s2124_s26, 128, %s2126_s20, %s218_s23, %s1911_s13, %s1911_s13, %s1912_s28  }
  0x73   : > { %s1425_s8 = sshll.u32 %s1901_s22, 6  ;;  %s265_s17 = scalar_lea.vmem [#allocation7], %s1337_s3 }
  0x74   : > { %s2160_s1 = scalar_lea.hbm %s2370_s2, %s1425_s8  ;;  %s273_s16 = sshll.u32 %s265_s17, 4  ;;  %s274_s16 = int_to_ptr.vmem [resolvable:$true] %s273_s16 }
  0x75   : > { %s1755_s7 = scalar_lea.hbm %s2160_s1, 64  ;;  %s1760_s28 = scalar_lea.hbm %s2370_s2, 128 }
  0x76   : > { %p1756_p1 = scmp.ne.s32.totalorder %s2160_s1, %s1755_s7  ;;  %p1761_p4 = scmp.lt.u32.totalorder %s2160_s1, %s2370_s2 }
  0x77   : > { %p1762_p8 = scmp.lt.u32.totalorder %s1760_s28, %s1755_s7  ;;  %p1764_p10 = scmp.lt.u32.totalorder %s1755_s7, %s2160_s1 }
  0x78   : > { %p1758_p6 = pnand %p1756_p1, %p2049_p2 }
  0x79   : > { %p1763_p9 = por %p1762_p8, %p1761_p4 }
  0x7a   : > { %p1759_p12 = pneg %p1758_p6 }
  0x7b   : > { %p1765_p13 = por %p1764_p10, %p1763_p9 }
  0x7d   : > { %p1766_p7 = pnand %p1765_p13, %p1759_p12 }
  0x7f   : > { %1769 = shalt.err (!%p1766_p7)
}
  0x80   : > { %s1770_s3 = scalar_lea.vmem %s274_s16, 64  ;;  %s1914_s11 = smov [#allocation7]  }
  0x81   : > { %p1771_p11 = scmp.ne.s32.totalorder %s274_s16, %s1770_s3  ;;  %s1775_s8 = sshll.u32 %s1914_s11, 4  ;;  %s1776_s8 = int_to_ptr.vmem [resolvable:$false] %s1775_s8 }
  0x82   : > { %s1777_s14 = scalar_lea.vmem %s1776_s8, 128  ;;  %p1778_p1 = scmp.lt.s32.totalorder %s274_s16, %s1776_s8 }
  0x83   : > { %p1773_p3 = pnand %p1771_p11, %p2049_p2  ;;  %p1779_p6 = scmp.lt.s32.totalorder %s1777_s14, %s1770_s3 }
  0x85   : > { %p1774_p5 = pneg %p1773_p3  ;;  %p1780_p0 = por %p1779_p6, %p1778_p1 }
  0x87   : > { %p1781_p4 = pnand %p1780_p0, %p1774_p5 }
  0x89   : > { %1784 = shalt.err (!%p1781_p4)
}
  0x8a   : > { %p2405_p8 = scmp.ne.s32.totalorder %s2397_s12, 0  ;;  %s1343_s15 = sshll.u32 %s1901_s22, 4 }
  0x8b   : > { %s304_s17 = scalar_lea.vmem [#allocation10], %s2019_s9  ;;  %s309_s28 = scalar_lea.hbm %s2372_s4, %s1343_s15 }
  0x8c   : > { %1500 = dma.hbm_to_vmem [thread:$0]  (!%p2405_p8), %s2160_s1, 64, %s274_s16, %s2043_s27  }
  0x8d   : > { %s311_s7 = sshll.u32 %s304_s17, 4  ;;  %s1785_s26 = scalar_lea.hbm %s309_s28, 16  ;;  %s312_s7 = int_to_ptr.vmem [resolvable:$true] %s311_s7 }
  0x8e   : > { %p1786_p12 = scmp.ne.s32.totalorder %s309_s28, %s1785_s26  ;;  %s1790_s11 = scalar_lea.hbm %s2372_s4, 32 }
  0x8f   : > { %p1791_p10 = scmp.lt.u32.totalorder %s309_s28, %s2372_s4  ;;  %p1792_p13 = scmp.lt.u32.totalorder %s1790_s11, %s1785_s26 }
  0x90   : > { %p1788_p0 = pnand %p1786_p12, %p2049_p2  ;;  %p1794_p11 = scmp.lt.u32.totalorder %s1785_s26, %s309_s28 }
  0x91   : > { %p1793_p7 = por %p1792_p13, %p1791_p10 }
  0x92   : > { %p1789_p9 = pneg %p1788_p0 }
  0x93   : > { %p1795_p3 = por %p1794_p11, %p1793_p7 }
  0x95   : > { %p1796_p5 = pnand %p1795_p3, %p1789_p9 }
  0x97   : > { %1799 = shalt.err (!%p1796_p5)
}
  0x98   : > { %s1800_s9 = scalar_lea.vmem %s312_s7, 16  ;;  %s1915_s27 = smov [#allocation10]  }
  0x99   : > { %p1801_p1 = scmp.ne.s32.totalorder %s312_s7, %s1800_s9  ;;  %s1805_s1 = sshll.u32 %s1915_s27, 4  ;;  %s1806_s1 = int_to_ptr.vmem [resolvable:$false] %s1805_s1 }
  0x9a   : > { %s1807_s16 = scalar_lea.vmem %s1806_s1, 32  ;;  %p1808_p12 = scmp.lt.s32.totalorder %s312_s7, %s1806_s1 }
  0x9b   : > { %p1803_p6 = pnand %p1801_p1, %p2049_p2  ;;  %p1809_p0 = scmp.lt.s32.totalorder %s1807_s16, %s1800_s9 }
  0x9d   : > { %p1804_p4 = pneg %p1803_p6  ;;  %p1810_p8 = por %p1809_p0, %p1808_p12 }
  0x9f   : > { %p1811_p10 = pnand %p1810_p8, %p1804_p4 }
  0xa1   : > { %1814 = shalt.err (!%p1811_p10)
}
  0xa2   : > { %p2406_p13 = scmp.ne.s32.totalorder %s2397_s12, 0  ;;  %p2407_p9 = scmp.ne.s32.totalorder %s2400_s10, 0 }
  0xa3   : > { %s2203_s29 = sand.u32 (!%p2407_p9), 1, %s1889_s19   ;;  %p2408_p2 = scmp.ne.s32.totalorder (!%p2407_p9), %s2392_s30, 0 }
  0xa4   : > { %1506 = dma.hbm_to_vmem [thread:$0]  (!%p2406_p13), %s309_s28, 16, %s312_s7, %s2092_s25  }
  0xa5   : > { %320 = sbr.rel (%p2407_p9) target bundleno = 697 (0x2b9), region = 40  ;;  %s1345_s15 = sshll.u32 (!%p2407_p9), %s2203_s29, 3 }
  0xa6   : > { %s323_s17 = scalar_lea.sflag (!%p2407_p9), [#allocation3], %s2203_s29  ;;  %s2209_s23 = scalar_lea.vmem (!%p2407_p9), [#allocation2], %s1345_s15 }
  0xac   : > { %1868 = dma.done.wait (%p2408_p2), %s323_s17, 128  }
  0xad   : > { %1870 = vsyncadd (%p2408_p2), %s323_s17, 4294967168  ;;  %s331_s12 = sand.u32 1, %s1981_s24   ;;  %s1346_s10 = sshll.u32 %s2203_s29, 8 }
  0xae   : > { %s332_s25 = scalar_lea.sflag [#allocation6], %s331_s12  ;;  %s2217_s7 = scalar_lea.vmem [#allocation5], %s1346_s10 }
  0xaf   : > { %1872 = dma.done.wait (%p2408_p2), %s332_s25, 4160  }
  0xb0   : > { %1874 = vsyncadd (%p2408_p2), %s332_s25, 4294963136  ;;  %s1347_s13 = sshll.u32 %s2203_s29, 2  ;;  %s350_s26 = scalar_lea.sflag [#allocation9], %s331_s12 }
  0xb1   : > { %s2224_s28 = scalar_lea.vmem [#allocation7], %s1347_s13  ;;  %s2226_s20 = scalar_lea.vmem [#allocation8], %s1346_s10 }
  0xb2   : > { %1876 = dma.done.wait (%p2408_p2), %s350_s26, 4112  }
  0xb3   : > { %1878 = vsyncadd (%p2408_p2), %s350_s26, 4294963184  ;;  %v1916_v0 = vmov 0   ;;  %v1568_v1 = vld [vmem:[%s2217_s7 + $0x4] ss:$16 sps:$4 sm:$0xff]   ;;  %v1570_v2 = vld [vmem:[%s2217_s7 + $0xc] ss:$16 sps:$4 sm:$0xff]  }
  0xb4   : > { %664 = vmatprep.mubr.bf16.mxu0 %v1916_v0  ;;  %707 = vmatprep.mubr.bf16.mxu1 %v1916_v0  ;;  %v1572_v3 = vld [vmem:[%s2217_s7] ss:$16 sps:$4 sm:$0xff]   ;;  %v1573_v4 = vld [vmem:[%s2217_s7 + $0x8] ss:$16 sps:$4 sm:$0xff]   ;;  %v1574_v5 = vld [vmem:[%s2217_s7 + $0x24] ss:$16 sps:$4 sm:$0xff]  }
  0xb5   : > { %632 = vmatprep.subr.bf16.mxu0 %v1568_v1  ;;  %675 = vmatprep.subr.bf16.mxu1 %v1570_v2  ;;  %v1576_v6 = vld [vmem:[%s2217_s7 + $0x2c] ss:$16 sps:$4 sm:$0xff]   ;;  %v1578_v7 = vld [vmem:[%s2217_s7 + $0x20] ss:$16 sps:$4 sm:$0xff]   ;;  %v1579_v8 = vld [vmem:[%s2217_s7 + $0x28] ss:$16 sps:$4 sm:$0xff]   ;;  %v446_v2 = vlaneseq }
  0xb6   : > { %633 = vmatpush1.bf16.msra.mxu0 %v1572_v3  ;;  %676 = vmatpush1.bf16.msra.mxu1 %v1573_v4  ;;  %v1580_v9 = vld [vmem:[%s2217_s7 + $0x44] ss:$16 sps:$4 sm:$0xff]   ;;  %v1582_v10 = vld [vmem:[%s2217_s7 + $0x4c] ss:$16 sps:$4 sm:$0xff]   ;;  %v1584_v11 = vld [vmem:[%s2217_s7 + $0x40] ss:$16 sps:$4 sm:$0xff]  }
  0xb7   : > { %634 = vmatprep.subr.bf16.mxu0 %v1574_v5  ;;  %677 = vmatprep.subr.bf16.mxu1 %v1576_v6  ;;  %v1585_v12 = vld [vmem:[%s2217_s7 + $0x48] ss:$16 sps:$4 sm:$0xff]   ;;  %v1586_v13 = vld [vmem:[%s2217_s7 + $0x64] ss:$16 sps:$4 sm:$0xff]   ;;  %v1588_v14 = vld [vmem:[%s2217_s7 + $0x6c] ss:$16 sps:$4 sm:$0xff]  }
  0xb8   : > { %v1590_v15 = vld [vmem:[%s2217_s7 + $0x60] ss:$16 sps:$4 sm:$0xff]   ;;  %v1591_v16 = vld [vmem:[%s2217_s7 + $0x68] ss:$16 sps:$4 sm:$0xff]   ;;  %v1592_v17 = vld [vmem:[%s2217_s7 + $0x84] ss:$16 sps:$4 sm:$0xff]  }
  0xb9   : > { %v1594_v18 = vld [vmem:[%s2217_s7 + $0x8c] ss:$16 sps:$4 sm:$0xff]   ;;  %v1596_v19 = vld [vmem:[%s2217_s7 + $0x80] ss:$16 sps:$4 sm:$0xff]   ;;  %v1597_v20 = vld [vmem:[%s2217_s7 + $0x88] ss:$16 sps:$4 sm:$0xff]  }
  0xba   : > { %635 = vmatpush1.bf16.msra.mxu0 %v1578_v7  ;;  %678 = vmatpush1.bf16.msra.mxu1 %v1579_v8  ;;  %v1598_v21 = vld [vmem:[%s2217_s7 + $0xa4] ss:$16 sps:$4 sm:$0xff]   ;;  %v1600_v22 = vld [vmem:[%s2217_s7 + $0xac] ss:$16 sps:$4 sm:$0xff]   ;;  %v1602_v23 = vld [vmem:[%s2217_s7 + $0xa0] ss:$16 sps:$4 sm:$0xff]  }
  0xbb   : > { %636 = vmatprep.subr.bf16.mxu0 %v1580_v9  ;;  %679 = vmatprep.subr.bf16.mxu1 %v1582_v10  ;;  %v1603_v24 = vld [vmem:[%s2217_s7 + $0xa8] ss:$16 sps:$4 sm:$0xff]   ;;  %v1604_v25 = vld [vmem:[%s2217_s7 + $0xc4] ss:$16 sps:$4 sm:$0xff]   ;;  %v1606_v26 = vld [vmem:[%s2217_s7 + $0xcc] ss:$16 sps:$4 sm:$0xff]  }
  0xbc   : > { %v1608_v27 = vld [vmem:[%s2217_s7 + $0xc0] ss:$16 sps:$4 sm:$0xff]   ;;  %v1609_v28 = vld [vmem:[%s2217_s7 + $0xc8] ss:$16 sps:$4 sm:$0xff]   ;;  %v1610_v29 = vld [vmem:[%s2217_s7 + $0xe4] ss:$16 sps:$4 sm:$0xff]  }
  0xbd   : > { %v1612_v30 = vld [vmem:[%s2217_s7 + $0xec] ss:$16 sps:$4 sm:$0xff]   ;;  %v1614_v31 = vld [vmem:[%s2217_s7 + $0xe0] ss:$16 sps:$4 sm:$0xff]   ;;  %v1615_v32 = vld [vmem:[%s2217_s7 + $0xe8] ss:$16 sps:$4 sm:$0xff]  }
  0xbe   : > { %637 = vmatpush1.bf16.msra.mxu0 %v1584_v11  ;;  %680 = vmatpush1.bf16.msra.mxu1 %v1585_v12  ;;  %v1616_v33 = vld [vmem:[%s2209_s23] sm:$0xff]   ;;  %v1617_v34 = vld [vmem:[%s2226_s20 + $0x40] sm:$0xff]   ;;  %v1629_v46 = vld [vmem:[%s2226_s20 + $0x58] sm:$0xff]   ;;  %v447_v3 = vshrl.u32 %v446_v2, 7  ;;  %s361_s24 = scalar_lea.vmem [#allocation10], %s2203_s29  ;;  %s1429_s30 = sshll.u32 %s1897_s21, 7 }
  0xbf   : > { %638 = vmatprep.subr.bf16.mxu0 %v1586_v13  ;;  %681 = vmatprep.subr.bf16.mxu1 %v1588_v14  ;;  %v1618_v35 = vld [vmem:[%s2226_s20 + $0xc0] sm:$0xff]   ;;  %v1621_v38 = vld [vmem:[%s2226_s20 + $0x48] sm:$0xff]   ;;  %v1625_v42 = vld [vmem:[%s2226_s20 + $0x50] sm:$0xff]   ;;  %s406_s3 = scalar_lea.vmem [#allocation11], %s1345_s15  ;;  %s2317_s9 = scalar_lea.hbm %s2373_s5, %s1429_s30 }
  0xc0   : > { %v1619_v36 = vld [vmem:[%s2226_s20] sm:$0xff]   ;;  %v1622_v39 = vld [vmem:[%s2226_s20 + $0xc8] sm:$0xff]   ;;  %v1626_v43 = vld [vmem:[%s2226_s20 + $0xd0] sm:$0xff]   ;;  %v448_v4 = vsub.s32 0, %v447_v3  ;;  %v456_v5 = vsub.s32 2, %v447_v3  ;;  %v452_v7 = vsub.s32 1, %v447_v3 }
  0xc1   : > { %v1620_v37 = vld [vmem:[%s2226_s20 + $0x80] sm:$0xff]   ;;  %v1623_v40 = vld [vmem:[%s2226_s20 + $0x8] sm:$0xff]   ;;  %v1627_v44 = vld [vmem:[%s2226_s20 + $0x10] sm:$0xff]   ;;  %v460_v8 = vsub.s32 3, %v447_v3  ;;  %s1157_s11 = sshll.u32 %s406_s3, 4  ;;  %s1142_s27 = scalar_lea.sflag [#allocation4], %s2203_s29  ;;  %s2319_s11 = int_to_ptr.vmem [resolvable:$true] %s1157_s11 }
  0xc2   : > { %639 = vmatpush1.bf16.msra.mxu0 %v1590_v15  ;;  %682 = vmatpush1.bf16.msra.mxu1 %v1591_v16  ;;  %v1624_v41 = vld [vmem:[%s2226_s20 + $0x88] sm:$0xff]   ;;  %v1628_v45 = vld [vmem:[%s2226_s20 + $0x90] sm:$0xff]   ;;  %v1630_v47 = vld [vmem:[%s2226_s20 + $0xd8] sm:$0xff]   ;;  %s1815_s1 = scalar_lea.vmem %s2319_s11, 128  ;;  %p2409_p7 = scmp.ne.s32.totalorder %s2393_s6, 0 }
  0xc3   : > { %640 = vmatprep.subr.bf16.mxu0 %v1592_v17  ;;  %683 = vmatprep.subr.bf16.mxu1 %v1594_v18  ;;  %v1631_v48 = vld [vmem:[%s2226_s20 + $0x18] sm:$0xff]   ;;  %v1633_v50 = vld [vmem:[%s2226_s20 + $0x60] sm:$0xff]   ;;  %v1637_v54 = vld [vmem:[%s2226_s20 + $0x68] sm:$0xff]   ;;  %p1816_p8 = scmp.ne.s32.totalorder %s2319_s11, %s1815_s1  ;;  %s1917_s21 = smov [#allocation11]  }
  0xc4   : > { %v1632_v49 = vld [vmem:[%s2226_s20 + $0x98] sm:$0xff]   ;;  %v1634_v51 = vld [vmem:[%s2226_s20 + $0xe0] sm:$0xff]   ;;  %v1638_v55 = vld [vmem:[%s2226_s20 + $0xe8] sm:$0xff]   ;;  %s1819_s16 = sshll.u32 %s1917_s21, 4  ;;  %s1820_s16 = int_to_ptr.vmem [resolvable:$false] %s1819_s16 }
  0xc5   : > { %v1635_v52 = vld [vmem:[%s2226_s20 + $0x20] sm:$0xff]   ;;  %v1639_v56 = vld [vmem:[%s2226_s20 + $0x28] sm:$0xff]   ;;  %v1641_v58 = vld [vmem:[%s2226_s20 + $0x70] sm:$0xff]   ;;  %p1817_p11 = pnand %p1816_p8, %p2409_p7  ;;  %s1821_s15 = scalar_lea.vmem %s1820_s16, 256 }
  0xc6   : > { %641 = vmatpush1.bf16.msra.mxu0 %v1596_v19  ;;  %684 = vmatpush1.bf16.msra.mxu1 %v1597_v20  ;;  %v1636_v53 = vld [vmem:[%s2226_s20 + $0xa0] sm:$0xff]   ;;  %v1640_v57 = vld [vmem:[%s2226_s20 + $0xa8] sm:$0xff]   ;;  %v1642_v59 = vld [vmem:[%s2226_s20 + $0xf0] sm:$0xff]   ;;  %p1822_p5 = scmp.lt.s32.totalorder %s2319_s11, %s1820_s16  ;;  %p1823_p1 = scmp.lt.s32.totalorder %s1821_s15, %s1815_s1 }
  0xc7   : > { %642 = vmatprep.subr.bf16.mxu0 %v1598_v21  ;;  %685 = vmatprep.subr.bf16.mxu1 %v1600_v22  ;;  %v1643_v60 = vld [vmem:[%s2226_s20 + $0x30] sm:$0xff]   ;;  %v1645_v62 = vld [vmem:[%s2226_s20 + $0x78] sm:$0xff]   ;;  %p1818_p3 = pneg %p1817_p11 }
  0xc8   : > { %v1644_v61 = vld [vmem:[%s2226_s20 + $0xb0] sm:$0xff]   ;;  %v1646_v63 = vld [vmem:[%s2226_s20 + $0xf8] sm:$0xff]   ;;  %p1824_p6 = por %p1823_p1, %p1822_p5 }
  0xc9   : > { %v1647_v0 = vld [vmem:[%s2226_s20 + $0x38] sm:$0xff]  }
  0xca   : > { %643 = vmatpush1.bf16.msra.mxu0 %v1602_v23  ;;  %686 = vmatpush1.bf16.msra.mxu1 %v1603_v24  ;;  %v1648_v1 = vld [vmem:[%s2226_s20 + $0xb8] sm:$0xff]   ;;  %p1825_p4 = pnand %p1824_p6, %p1818_p3 }
  0xcb   : > { %644 = vmatprep.subr.bf16.mxu0 %v1604_v25  ;;  %687 = vmatprep.subr.bf16.mxu1 %v1606_v26  ;;  %v444_v6 = vld [vmem:[%s2224_s28] sm:$0xf] }
  0xcc   : > { %v449_v9 = vrot.slane %v444_v6, %v448_v4  ;;  %v457_v10 = vrot.slane %v444_v6, %v456_v5  ;;  %v453_v11 = vrot.slane %v444_v6, %v452_v7  ;;  %v461_v12 = vrot.slane %v444_v6, %v460_v8 }
  0xce   : > { %645 = vmatpush1.bf16.msra.mxu0 %v1608_v27  ;;  %688 = vmatpush1.bf16.msra.mxu1 %v1609_v28 }
  0xcf   : > { %646 = vmatprep.subr.bf16.mxu0 %v1610_v29  ;;  %689 = vmatprep.subr.bf16.mxu1 %v1612_v30 }
  0xd2   : > { %647 = vmatpush1.bf16.msra.mxu0 %v1614_v31  ;;  %690 = vmatpush1.bf16.msra.mxu1 %v1615_v32 }
  0xd3   : > { %1435 = vmatprep.subr.bf16.mxu0 %v1617_v34  ;;  %1457 = vmatprep.subr.bf16.mxu1 %v1618_v35 }
  0xd5   : > { %665 = vmatmul.mubr.bf16.vlgmr.msra.gmra.mrb[0].mxu0 %v1616_v33  ;;  %708 = vmatmul.mubr.bf16.vlgmr.msra.gmra.mrb[0].mxu1 %v1616_v33 }
  0xd6   : > { %1436 = vmatpush3.bf16.msra.mxu0 %v1619_v36  ;;  %1458 = vmatpush3.bf16.msra.mxu1 %v1620_v37 }
  0xd7   : > { %1437 = vmatprep.subr.bf16.mxu0 %v1621_v38  ;;  %1459 = vmatprep.subr.bf16.mxu1 %v1622_v39 }
  0xda   : > { %1438 = vmatpush3.bf16.msra.mxu0 %v1623_v40  ;;  %1460 = vmatpush3.bf16.msra.mxu1 %v1624_v41 }
  0xdb   : > { %1439 = vmatprep.subr.bf16.mxu0 %v1625_v42  ;;  %1461 = vmatprep.subr.bf16.mxu1 %v1626_v43 }
  0xde   : > { %1440 = vmatpush3.bf16.msra.mxu0 %v1627_v44  ;;  %1462 = vmatpush3.bf16.msra.mxu1 %v1628_v45 }
  0xdf   : > { %1441 = vmatprep.subr.bf16.mxu0 %v1629_v46  ;;  %1463 = vmatprep.subr.bf16.mxu1 %v1630_v47 }
  0xe2   : > { %1442 = vmatpush3.bf16.msra.mxu0 %v1631_v48  ;;  %1464 = vmatpush3.bf16.msra.mxu1 %v1632_v49 }
  0xe3   : > { %1443 = vmatprep.subr.bf16.mxu0 %v1633_v50  ;;  %1465 = vmatprep.subr.bf16.mxu1 %v1634_v51 }
  0xe6   : > { %1444 = vmatpush3.bf16.msra.mxu0 %v1635_v52  ;;  %1466 = vmatpush3.bf16.msra.mxu1 %v1636_v53 }
  0xe7   : > { %1445 = vmatprep.subr.bf16.mxu0 %v1637_v54  ;;  %1467 = vmatprep.subr.bf16.mxu1 %v1638_v55 }
  0xea   : > { %1446 = vmatpush3.bf16.msra.mxu0 %v1639_v56  ;;  %1468 = vmatpush3.bf16.msra.mxu1 %v1640_v57 }
  0xeb   : > { %1447 = vmatprep.subr.bf16.mxu0 %v1641_v58  ;;  %1469 = vmatprep.subr.bf16.mxu1 %v1642_v59 }
  0xee   : > { %1448 = vmatpush3.bf16.msra.mxu0 %v1643_v60  ;;  %1470 = vmatpush3.bf16.msra.mxu1 %v1644_v61 }
  0xef   : > { %1449 = vmatprep.subr.bf16.mxu0 %v1645_v62  ;;  %1471 = vmatprep.subr.bf16.mxu1 %v1646_v63 }
  0xf2   : > { %1450 = vmatpush3.bf16.msra.mxu0 %v1647_v0  ;;  %1472 = vmatpush3.bf16.msra.mxu1 %v1648_v1 }
 0x1a8   : > { %v666_v13 = vpop.f32.mrb[0].mxu0  ;;  %v709_v14 = vpop.f32.mrb[0].mxu1 }
 0x1a9   : > { %v667_v15 = vadd.f32 %v666_v13, %v449_v9  ;;  %v710_v16 = vadd.f32 %v709_v14, %v457_v10  ;;  %v668_v17 = vpop.f32.mrb[1].mxu0  ;;  %v711_v18 = vpop.f32.mrb[1].mxu1 }
 0x1aa   : > { %v2298_v19 = vadd.f32 %v668_v17, %v453_v11  ;;  %v2300_v20 = vadd.f32 %v711_v18, %v461_v12  ;;  %v670_v21 = vpop.f32.mrb[2].mxu0  ;;  %v713_v22 = vpop.f32.mrb[2].mxu1 }
 0x1ab   : > { %v718_v23 = vmul.f32 %v667_v15, %v667_v15  ;;  %v720_v24 = vmul.f32 %v710_v16, %v710_v16  ;;  %v672_v25 = vpop.f32.mrb[3].mxu0  ;;  %v715_v26 = vpop.f32.mrb[3].mxu1  ;;  %v671_v31 = vadd.f32 %v670_v21, %v449_v9  ;;  %v714_v32 = vadd.f32 %v713_v22, %v457_v10 }
 0x1ac   : > { %v719_v27 = vmul.f32 %v2298_v19, %v2298_v19  ;;  %v721_v28 = vmul.f32 %v2300_v20, %v2300_v20  ;;  %v673_v35 = vadd.f32 %v672_v25, %v453_v11  ;;  %v716_v39 = vadd.f32 %v715_v26, %v461_v12 }
 0x1ad   : > { %v726_v29 = vmul.f32 0.035677407, %v718_v23  ;;  %v728_v30 = vmul.f32 0.035677407, %v720_v24  ;;  %v722_v38 = vmul.f32 %v671_v31, %v671_v31  ;;  %v724_v42 = vmul.f32 %v714_v32, %v714_v32 }
 0x1ae   : > { %v727_v33 = vmul.f32 0.035677407, %v719_v27  ;;  %v729_v34 = vmul.f32 0.035677407, %v721_v28  ;;  %v723_v46 = vmul.f32 %v673_v35, %v673_v35  ;;  %v725_v52 = vmul.f32 %v716_v39, %v716_v39 }
 0x1af   : > { %v734_v36 = vadd.f32 0.7978846, %v726_v29  ;;  %v736_v37 = vadd.f32 0.7978846, %v728_v30  ;;  %v730_v45 = vmul.f32 0.035677407, %v722_v38 }
 0x1b0   : > { %v735_v40 = vadd.f32 0.7978846, %v727_v33  ;;  %v737_v41 = vadd.f32 0.7978846, %v729_v34  ;;  %v732_v49 = vmul.f32 0.035677407, %v724_v42 }
 0x1b1   : > { %v742_v43 = vmul.f32 %v734_v36, %v667_v15  ;;  %v744_v44 = vmul.f32 %v736_v37, %v710_v16  ;;  %v738_v50 = vadd.f32 0.7978846, %v730_v45  ;;  %v731_v51 = vmul.f32 0.035677407, %v723_v46 }
 0x1b2   : > { %v743_v47 = vmul.f32 %v735_v40, %v2298_v19  ;;  %v745_v48 = vmul.f32 %v737_v41, %v2300_v20  ;;  %v740_v53 = vadd.f32 0.7978846, %v732_v49  ;;  %v733_v56 = vmul.f32 0.035677407, %v725_v52 }
 0x1b3   : > { %1649 = vtanh.f32 %v742_v43  ;;  %v746_v54 = vmul.f32 %v738_v50, %v671_v31  ;;  %v739_v55 = vadd.f32 0.7978846, %v731_v51  ;;  %v758_v3 = vmul.f32 0.5, %v667_v15 }
 0x1b4   : > { %1651 = vtanh.f32 %v744_v44  ;;  %v748_v57 = vmul.f32 %v740_v53, %v714_v32  ;;  %v741_v59 = vadd.f32 0.7978846, %v733_v56  ;;  %v760_v6 = vmul.f32 0.5, %v710_v16 }
 0x1b5   : > { %1653 = vtanh.f32 %v743_v47  ;;  %v747_v58 = vmul.f32 %v739_v55, %v673_v35  ;;  %v762_v7 = vmul.f32 0.5, %v671_v31  ;;  %v759_v11 = vmul.f32 0.5, %v2298_v19 }
 0x1b6   : > { %1655 = vtanh.f32 %v745_v48  ;;  %v749_v60 = vmul.f32 %v741_v59, %v716_v39  ;;  %v764_v12 = vmul.f32 0.5, %v714_v32  ;;  %v763_v14 = vmul.f32 0.5, %v673_v35 }
 0x1b7   : > { %1657 = vtanh.f32 %v746_v54  ;;  %v761_v15 = vmul.f32 0.5, %v2300_v20  ;;  %v765_v16 = vmul.f32 0.5, %v716_v39  ;;  %v1383_v20 = vld [vmem:[%s361_s24] ss:$0 sm:$0xff] }
 0x1b8   : > { %1659 = vtanh.f32 %v748_v57 }
 0x1b9   : > { %1661 = vtanh.f32 %v747_v58 }
 0x1ba   : > { %1663 = vtanh.f32 %v749_v60 }
 0x1bd   : > { %v1650_v61 = vpop.eup %1649 }
 0x1be   : > { %v1652_v62 = vpop.eup %1651  ;;  %v766_v1 = vadd.f32 1.0, %v1650_v61 }
 0x1bf   : > { %v1654_v63 = vpop.eup %1653  ;;  %v768_v4 = vadd.f32 1.0, %v1652_v62 }
 0x1c0   : > { %v1656_v0 = vpop.eup %1655  ;;  %v767_v9 = vadd.f32 1.0, %v1654_v63  ;;  %v774_v17 = vmul.f32 %v766_v1, %v758_v3 }
 0x1c1   : > { %v1658_v2 = vpop.eup %1657  ;;  %v769_v22 = vadd.f32 1.0, %v1656_v0  ;;  %v776_v24 = vmul.f32 %v768_v4, %v760_v6 }
 0x1c2   : > { %v1660_v5 = vpop.eup %1659  ;;  %v770_v8 = vadd.f32 1.0, %v1658_v2  ;;  %v775_v26 = vmul.f32 %v767_v9, %v759_v11 }
 0x1c3   : > { %v1662_v10 = vpop.eup %1661  ;;  %v772_v13 = vadd.f32 1.0, %v1660_v5  ;;  %v777_v31 = vmul.f32 %v769_v22, %v761_v15 }
 0x1c4   : > { %v778_v18 = vmul.f32 %v770_v8, %v762_v7  ;;  %v771_v21 = vadd.f32 1.0, %v1662_v10  ;;  %v1664_v23 = vpop.eup %1663 }
 0x1c5   : > { %v780_v25 = vmul.f32 %v772_v13, %v764_v12  ;;  %v773_v28 = vadd.f32 1.0, %v1664_v23 }
 0x1c6   : > { %v779_v27 = vmul.f32 %v771_v21, %v763_v14  ;;  %v782_v29 = vpack.c.bf16 %v778_v18, %v774_v17 }
 0x1c7   : > { %v784_v30 = vpack.c.bf16 %v780_v25, %v776_v24  ;;  %v781_v32 = vmul.f32 %v773_v28, %v765_v16 }
 0x1c8   : > { %v783_v19 = vpack.c.bf16 %v779_v27, %v775_v26 }
 0x1c9   : > { %v785_v33 = vpack.c.bf16 %v781_v32, %v777_v31 }
 0x1ca   : > { %1081 = vmatprep.mubr.bf16.mxu0 %v783_v19 }
 0x1cb   : > { %1082 = vmatmul.mubr.bf16.vlgmr.msra.gmra.mrb[4].mxu0 %v782_v29  ;;  %1122 = vmatprep.mubr.bf16.mxu1 %v785_v33 }
 0x1cc   : > { %1123 = vmatmul.mubr.bf16.vlgmr.msra.gmra.mrb[4].mxu1 %v784_v30 }
 0x29e   : > { %v1451_v34 = vpop.f32.mrb[4].mxu0 }
 0x29f   : > { %v1452_v35 = vpop.f32.mrb[5].mxu0  ;;  %v1473_v36 = vpop.f32.mrb[4].mxu1 }
 0x2a0   : > { %v1453_v37 = vadd.f32 %v1452_v35, %v1451_v34  ;;  %v1454_v38 = vpop.f32.mrb[6].mxu0  ;;  %v1474_v39 = vpop.f32.mrb[5].mxu1 }
 0x2a1   : > { %v1455_v40 = vpop.f32.mrb[7].mxu0  ;;  %v1475_v42 = vadd.f32 %v1474_v39, %v1473_v36  ;;  %v1476_v43 = vpop.f32.mrb[6].mxu1 }
 0x2a2   : > { %v1084_v41 = vadd.f32 %v1453_v37, %v1383_v20  ;;  %v1456_v44 = vadd.f32 %v1455_v40, %v1454_v38  ;;  %v1477_v45 = vpop.f32.mrb[7].mxu1 }
 0x2a3   : > { %v1478_v48 = vadd.f32 %v1477_v45, %v1476_v43 }
 0x2a4   : > { %v1125_v46 = vadd.f32 %v1475_v42, %v1084_v41  ;;  %v1087_v47 = vadd.f32 %v1456_v44, %v1383_v20 }
 0x2a6   : > { %v1128_v49 = vadd.f32 %v1478_v48, %v1087_v47 }
 0x2a8   : > { %v1433_v50 = vpack.c.bf16 %v1128_v49, %v1125_v46 }
 0x2aa   : > { %1434 = vst [vmem:[%s406_s3] sm:$0xff] %v1433_v50  }
 0x2ab   : > { %1828 = shalt.err (!%p1825_p4)
}
 0x2ac   : > { %s1829_s17 = scalar_lea.hbm %s2317_s9, 128  ;;  %s1833_s10 = scalar_lea.hbm %s2373_s5, 256 }
 0x2ad   : > { %p1830_p12 = scmp.ne.s32.totalorder %s2317_s9, %s1829_s17  ;;  %p1834_p13 = scmp.lt.u32.totalorder %s2317_s9, %s2373_s5 }
 0x2ae   : > { %p1835_p9 = scmp.lt.u32.totalorder %s1833_s10, %s1829_s17  ;;  %p1837_p8 = scmp.lt.u32.totalorder %s1829_s17, %s2317_s9 }
 0x2af   : > { %p1831_p0 = pnand %p1830_p12, %p2409_p7 }
 0x2b0   : > { %p1836_p2 = por %p1835_p9, %p1834_p13 }
 0x2b1   : > { %p1832_p10 = pneg %p1831_p0 }
 0x2b2   : > { %p1838_p11 = por %p1837_p8, %p1836_p2 }
 0x2b4   : > { %p1839_p3 = pnand %p1838_p11, %p1832_p10 }
 0x2b6   : > { %1842 = shalt.err (!%p1839_p3)
}
 0x2b7   : > { %s1918_s13 = smov 64   ;;  %s1919_s28 = smov 4  }
 0x2b8   : > { %1489 = dma.vmem_to_hbm [thread:$0]  (%p2409_p7), %s2319_s11, 128, %s2317_s9, %s1142_s27, %s1918_s13, %s1918_s13, %s1919_s28  }
 0x2b9 PF: > { %s2410_s26 = sld [smem:[#allocation20_spill]]  ;;  %s2411_s20 = sld [smem:[#allocation17_spill]] }
 0x2ba   : > { %s1172_s24 = sand.u32 1, %s1885_s18  }
 0x2bb   : > { %s1173_s30 = scalar_lea.sflag [#allocation4], %s1172_s24 }
 0x2bf   : > { %p2412_p5 = scmp.ne.s32.totalorder %s2410_s26, 0  ;;  %p2413_p1 = scmp.ge.s32.totalorder %s2411_s20, 2 }
 0x2c1   : > { %p1508_p6 = pnand %p2413_p1, %p2412_p5 }
 0x2c3   : > { %1880 = dma.done.wait (!%p1508_p6), %s1173_s30, 128  }
 0x2c4   : > { %1882 = vsyncadd (!%p1508_p6), %s1173_s30, 4294967168  ;;  %s27_s23 = sadd.s32 1, %s2411_s20   ;;  %s2414_s3 = sld [smem:[#allocation16_spill]] }
 0x2c5   : > { %p24_p4 = scmp.ge.s32.totalorder %s27_s23, 4   ;;  %s2415_s20 = sld [smem:[#allocation19_spill]] }
 0x2c6   : > { %s2416_s6 = sld [smem:[#allocation18_spill]]  ;;  %s2417_s18 = smov %s1889_s19 }
 0x2c7   : > { %s2419_s21 = smov %s1901_s22  ;;  %26 = sbr.rel (!%p24_p4) target bundleno = 13 (0xd), region = 133 }
 0x2ca   : > { %s2418_s19 = smov %s2414_s3 }
 0x2cc   : > { %s2420_s22 = smov %s2416_s6 }
 0x2ce   :  { %1178 = vsyncpa [#allocation3], 1 }
 0x2cf   :  { %1180 = vsyncpa [#allocation3 + $0x1], 1 }
 0x2d0   :  { %1181 = vsyncpa [#allocation6], 1 }
 0x2d1   :  { %1183 = vsyncpa [#allocation6 + $0x1], 1 }
 0x2d2   :  { %1184 = vsyncpa [#allocation9], 1 }
 0x2d3   :  { %1186 = vsyncpa [#allocation9 + $0x1], 1 }
 0x2d4   :  { %1187 = vsyncpa [#allocation4], 1 }
 0x2d5   :  { %1189 = vsyncpa [#allocation4 + $0x1], 1 }

</bundles_post_ra>
